<compile_context>
chip_gen: v7x
topology: tpu7x:2x2x1
jax: 0.10.0
libtpu: 0.0.40
codegen_flags: <defaults>
</compile_context>

<pallas_src>
import functools
import math

import jax
import jax.numpy as jnp
import numpy as np
from jax import lax
from jax.experimental import pallas as pl
from jax.experimental.pallas import tpu as pltpu

_LANE = 128
_MAX_WIDTH = 1024        # cap on packed lane width (8 vregs per sublane row)
_TARGET_WIDTH = 512      # preferred packed lane width


def _choose_group(out_classes):
    """How many consecutive rows to fold into the lane axis (lane-dense packing)."""
    if out_classes >= _LANE:
        return 1
    base = _LANE // math.gcd(out_classes, _LANE)     # smallest g with g*C % 128 == 0
    if base * out_classes <= _MAX_WIDTH:
        group = base * max(1, _TARGET_WIDTH // (base * out_classes))
        if group < 8:                                # keep matmul K sublane-aligned
            group = base * pl.cdiv(8, base)
    else:
        # Exact lane-dense packing would be too wide (e.g. C=17); get within a
        # few lanes of _MAX_WIDTH with a sublane-aligned group instead.
        group = max(8, (_MAX_WIDTH // out_classes) // 8 * 8)
    return group


def _onehot_kernel(*refs, num_classes, rule, group):
    # refs: x, [rep, cls (group>1)], [dist (rule=='dist')], out
    if group > 1:
        if rule == "dist":
            x_ref, rep_ref, cls_ref, dist_ref, o_ref = refs
        else:
            x_ref, rep_ref, cls_ref, o_ref = refs
            dist_ref = None
        # Clamp: OOB -> num_classes (that's the dummy class for rule='dummy',
        # and matches no class otherwise); negatives -> -1 (all-zero row).
        # After the clamp every value is < 128, so the f32 MXU replication and
        # the equality compare below are exact.
        x = jnp.clip(x_ref[...], -1, num_classes).astype(jnp.float32)   # (bp, group)
        x_rep = jnp.dot(x, rep_ref[...],
                        preferred_element_type=jnp.float32)             # (bp, width)
        one_hot = (x_rep == cls_ref[...]).astype(jnp.float32)
        oob = x_rep >= jnp.float32(num_classes)
    else:
        if rule == "dist":
            x_ref, dist_ref, o_ref = refs
        else:
            x_ref, o_ref = refs
            dist_ref = None
        width = o_ref.shape[-1]
        x = jnp.clip(x_ref[...], -1, num_classes)                       # (bp, 1) int32
        cls = lax.broadcasted_iota(jnp.int32, (1, width), 1)
        one_hot = (x == cls).astype(jnp.float32)                        # (bp, width)
        oob = x >= num_classes

    if rule in ("zero", "dummy"):
        # OOB already handled by the clamp: it matches the dummy class for
        # 'dummy' and matches nothing for 'zero' -> no select needed.
        o_ref[...] = one_hot
    elif rule == "one_over_n":
        o_ref[...] = jnp.where(oob, jnp.float32(1.0 / num_classes), one_hot)
    else:  # 'dist'
        o_ref[...] = jnp.where(oob, dist_ref[...], one_hot)


def one_hot_embedding(x, num_classes, rule="zero", dist=None,
                      target_step_bytes=8 * 1024 * 1024):
    """Pallas implementation of OneHotEmbedding.forward."""
    if rule not in ("zero", "one_over_n", "dummy", "dist"):
        # TODO(synk): rule == 'random' (torch.rand fill of OOB rows) not implemented.
        raise ValueError("Invalid rule")
    if rule == "dist" and dist is None:
        raise ValueError("rule='dist' requires a distribution")

    orig_shape = x.shape
    out_classes = num_classes + 1 if rule == "dummy" else num_classes

    m = int(math.prod(orig_shape))
    if m == 0:
        return jnp.zeros(orig_shape + (out_classes,), jnp.float32)

    group = _choose_group(out_classes)
    width = group * out_classes

    mp = pl.cdiv(m, group)                        # packed rows
    mp_pad = pl.cdiv(mp, 8) * 8                   # sublane-align only (last block ragged)

    # Block rows from a combined lane-padded (input + output) per-copy budget;
    # the pipeline double-buffers both.
    def pad_lanes(n):
        return pl.cdiv(n, _LANE) * _LANE

    bytes_per_row = (pad_lanes(width) + pad_lanes(group)) * 4
    bp = max(8, (int(target_step_bytes) // bytes_per_row) // 8 * 8)
    bp = min(bp, mp_pad)
    # keep >= ~8 grid steps when the input allows it (v7x: 2 TCs need a deep grid)
    bp = min(bp, max(8, pl.cdiv(pl.cdiv(mp_pad, 8), 8) * 8))
    grid = pl.cdiv(mp_pad, bp)

    # ---- glue: flatten, pad, lane-pack the indices ----
    x_flat = jnp.reshape(x, (-1,)).astype(jnp.int32)
    if mp_pad * group != m:
        x_flat = jnp.pad(x_flat, (0, mp_pad * group - m))
    x_packed = x_flat.reshape(mp_pad, group)

    operands = [x_packed]
    in_specs = [pl.BlockSpec((bp, group), lambda i: (i, 0))]

    if group > 1:
        # 0/1 replication matrix: column l picks x[:, l // out_classes].
        rep = np.zeros((group, width), np.float32)
        rep[np.arange(width) // out_classes, np.arange(width)] = 1.0
        operands.append(jnp.asarray(rep))
        in_specs.append(pl.BlockSpec((group, width), lambda i: (0, 0)))
        # per-lane class id: 0..C-1 tiled `group` times
        cls = np.tile(np.arange(out_classes, dtype=np.float32), group)[None, :]
        operands.append(jnp.asarray(cls))
        in_specs.append(pl.BlockSpec((1, width), lambda i: (0, 0)))

    if rule == "dist":
        dist_row = jnp.asarray(dist, jnp.float32).reshape(1, out_classes)
        operands.append(jnp.tile(dist_row, (1, group)))
        in_specs.append(pl.BlockSpec((1, width), lambda i: (0, 0)))

    kernel = functools.partial(_onehot_kernel, num_classes=num_classes,
                               rule=rule, group=group)

    # Explicit VMEM budget: double-buffered in/out blocks + resident constants.
    est = 2 * bp * bytes_per_row
    if group > 1:
        est += 2 * (group + 8) * pad_lanes(width) * 4
    if rule == "dist":
        est += 2 * 8 * pad_lanes(width) * 4
    vmem_limit = int(max(32 * 1024 * 1024,
                         min(est + 4 * 1024 * 1024, 96 * 1024 * 1024)))

    out_packed = pl.pallas_call(
        kernel,
        out_shape=jax.ShapeDtypeStruct((mp_pad, width), jnp.float32),
        grid=(grid,),
        in_specs=in_specs,
        out_specs=pl.BlockSpec((bp, width), lambda i: (i, 0)),
        compiler_params=pltpu.CompilerParams(
            dimension_semantics=("parallel",),       # megacore sharding on v7x
            vmem_limit_bytes=vmem_limit),
    )(*operands)

    # Undo the lane packing with a free contiguous reshape (no transpose).
    out = out_packed.reshape(mp_pad * group, out_classes)[:m]
    return out.reshape(orig_shape + (out_classes,))


def _reference(x, num_classes, rule="zero", dist=None):
    """Pure-JAX reference mirroring the PyTorch forward."""
    oob = x >= num_classes
    xc = jnp.where(oob, 0, x)
    if rule == "dummy":
        oh = jax.nn.one_hot(xc, num_classes + 1, dtype=jnp.float32)
        dummy = jnp.zeros((num_classes + 1,), jnp.float32).at[-1].set(1.0)
        return jnp.where(oob[..., None], dummy, oh)
    oh = jax.nn.one_hot(xc, num_classes, dtype=jnp.float32)
    if rule == "zero":
        return jnp.where(oob[..., None], 0.0, oh)
    if rule == "one_over_n":
        return jnp.where(oob[..., None], 1.0 / num_classes, oh)
    if rule == "dist":
        return jnp.where(oob[..., None], jnp.asarray(dist, jnp.float32), oh)
    raise ValueError("Invalid rule")


if __name__ == "__main__":
    key = jax.random.PRNGKey(0)
    num_classes = 16
    # small integer input; value range deliberately exceeds num_classes so the
    # out-of-range handling paths are exercised.
    x = jax.random.randint(key, (4, 64), 0, num_classes + 4, dtype=jnp.int32)
    dist = jnp.full((num_classes,), 1.0 / num_classes, jnp.float32)

    for rule, d in (("zero", None), ("one_over_n", None),
                    ("dummy", None), ("dist", dist)):
        out = jax.block_until_ready(one_hot_embedding(x, num_classes, rule=rule, dist=d))
        ref = _reference(x, num_classes, rule=rule, dist=d)
        assert out.shape == ref.shape, (rule, out.shape, ref.shape)
        assert jnp.allclose(out, ref, atol=1e-6), f"mismatch for rule={rule}"

    # class count that does not divide 128 (exact LCM packing: C=24 -> width 384)
    x24 = jax.random.randint(jax.random.PRNGKey(1), (4, 32), 0, 24 + 5, dtype=jnp.int32)
    out24 = jax.block_until_ready(one_hot_embedding(x24, 24, rule="one_over_n"))
    assert jnp.allclose(out24, _reference(x24, 24, rule="one_over_n"), atol=1e-6)

    # wide-class path (group == 1, lane width already >= 128)
    xw = jax.random.randint(jax.random.PRNGKey(2), (2, 8), 0, 260, dtype=jnp.int32)
    outw = jax.block_until_ready(one_hot_embedding(xw, 256, rule="one_over_n"))
    assert jnp.allclose(outw, _reference(xw, 256, rule="one_over_n"), atol=1e-6)

    print("KERNEL_OK")
</pallas_src>

<mosaic_0001>
module attributes {stable_mosaic.version = 11 : i64} {
  func.func @_onehot_kernel(%arg0: i32, %arg1: memref<8x32xi32, #tpu.memory_space<vmem>>, %arg2: memref<32x512xf32, #tpu.memory_space<vmem>>, %arg3: memref<1x512xf32, #tpu.memory_space<vmem>>, %arg4: memref<8x512xf32, #tpu.memory_space<vmem>>) attributes {dimension_semantics = [#tpu.dimension_semantics<parallel>], iteration_bounds = array<i64: 1>, scalar_prefetch = 0 : i64, scratch_operands = 0 : i64, tpu.core_type = #tpu.core_type<tc>, window_params = [{transform_indices = @transform_0, window_bounds = array<i64: 8, 32>}, {pipeline_mode = #tpu.pipeline_mode<synchronous>, transform_indices = @transform_1, window_bounds = array<i64: 32, 512>}, {pipeline_mode = #tpu.pipeline_mode<synchronous>, transform_indices = @transform_2, window_bounds = array<i64: 1, 512>}, {transform_indices = @transform_3, window_bounds = array<i64: 8, 512>}]} {
    %c0 = arith.constant 0 : index
    %c0_0 = arith.constant 0 : index
    %0 = vector.load %arg1[%c0, %c0_0] : memref<8x32xi32, #tpu.memory_space<vmem>>, vector<8x32xi32>
    %c-1_i32 = arith.constant -1 : i32
    %c16_i32 = arith.constant 16 : i32
    %1 = vector.broadcast %c-1_i32 : i32 to vector<8x32xi32>
    %2 = arith.maxsi %1, %0 : vector<8x32xi32>
    %3 = vector.broadcast %c16_i32 : i32 to vector<8x32xi32>
    %4 = arith.minsi %3, %2 : vector<8x32xi32>
    %5 = arith.sitofp %4 : vector<8x32xi32> to vector<8x32xf32>
    %c0_1 = arith.constant 0 : index
    %c0_2 = arith.constant 0 : index
    %6 = vector.load %arg2[%c0_1, %c0_2] : memref<32x512xf32, #tpu.memory_space<vmem>>, vector<32x512xf32>
    %cst = arith.constant dense<0.000000e+00> : vector<8x512xf32>
    %7 = tpu.matmul %5, %6, %cst {dimension_numbers = #tpu.dot_dimension_numbers<[1], [0], [0], [1], [0, 0, 1, 1], [], []>} : vector<8x32xf32>, vector<32x512xf32>, vector<8x512xf32> -> vector<8x512xf32>
    %c0_3 = arith.constant 0 : index
    %c0_4 = arith.constant 0 : index
    %8 = vector.load %arg3[%c0_3, %c0_4] : memref<1x512xf32, #tpu.memory_space<vmem>>, vector<1x512xf32>
    %9 = vector.broadcast %8 : vector<1x512xf32> to vector<8x512xf32>
    %10 = arith.cmpf oeq, %7, %9 : vector<8x512xf32>
    %11 = arith.extui %10 : vector<8x512xi1> to vector<8x512xi32>
    %12 = arith.sitofp %11 : vector<8x512xi32> to vector<8x512xf32>
    %c0_5 = arith.constant 0 : index
    %c0_6 = arith.constant 0 : index
    %13 = vector.load %arg4[%c0_5, %c0_6] : memref<8x512xf32, #tpu.memory_space<vmem>>, vector<8x512xf32>
    tpu.vector_store %arg4[%c0_5, %c0_6], %12 {strides = array<i32>} : memref<8x512xf32, #tpu.memory_space<vmem>>, vector<8x512xf32>,
    return
  }
  func.func @transform_0(%arg0: i32) -> (i32, i32) {
    %c0_i32 = arith.constant 0 : i32
    %c0_i32_0 = arith.constant 0 : i32
    return %arg0, %c0_i32 : i32, i32
  }
  func.func @transform_1(%arg0: i32) -> (i32, i32) {
    %c0_i32 = arith.constant 0 : i32
    %c0_i32_0 = arith.constant 0 : i32
    %c0_i32_1 = arith.constant 0 : i32
    return %c0_i32, %c0_i32_0 : i32, i32
  }
  func.func @transform_2(%arg0: i32) -> (i32, i32) {
    %c0_i32 = arith.constant 0 : i32
    %c0_i32_0 = arith.constant 0 : i32
    %c0_i32_1 = arith.constant 0 : i32
    return %c0_i32, %c0_i32_0 : i32, i32
  }
  func.func @transform_3(%arg0: i32) -> (i32, i32) {
    %c0_i32 = arith.constant 0 : i32
    %c0_i32_0 = arith.constant 0 : i32
    return %arg0, %c0_i32 : i32, i32
  }
}

</mosaic_0001>

<bundles_post_ra>
// kernel: tpu_custom_call.1
= control target key start
LH: loop header
LB: loop body
LE: loop exit
PB: predicated region body
PF: predicated region fallthrough
CT: control target
= control target key end

     0   :  { %8 = vsyncpa [#allocation3], 0  ;;  %s441_s0 = inlined_call_operand.hbm [shape: s32[8,32], index: 0, kind: input, shape index: {}]   ;;  %s442_s1 = inlined_call_operand.hbm [shape: f32[32,512], index: 1, kind: input, shape index: {}]   ;;  %s443_s2 = inlined_call_operand.vmem [shape: f32[1,512], index: 2, kind: input, shape index: {}]   ;;  %s444_s3 = inlined_call_operand.hbm [shape: f32[8,512], index: 3, kind: output, shape index: {}]  }
   0x1   :  { %9 = vsyncpa [#allocation6], 0 }
   0x2   :  { %10 = vsyncpa [#allocation4], 0  ;;  %s363_s12 = smov [#allocation2]   ;;  %s364_s14 = smov [#allocation5]  }
   0x3   :  { %s17_s13 = sshll.u32 %s363_s12, 4  ;;  %s26_s15 = sshll.u32 %s364_s14, 4  ;;  %s18_s13 = int_to_ptr.vmem [resolvable:$true] %s17_s13  ;;  %s389_s15 = int_to_ptr.vmem [resolvable:$true] %s26_s15 }
   0x4   :  { %s291_s18 = scalar_lea.hbm %s441_s0, 128 }
   0x5   :  { %p292_p0 = scmp.ne.s32.totalorder %s441_s0, %s291_s18  ;;  %p295_p1 = scmp.lt.u32.totalorder %s291_s18, %s441_s0 }
   0x7   :  { %p297_p2 = pnand %p295_p1, %p292_p0 }
   0x9   :  { %300 = shalt.err (!%p297_p2)
}
   0xa   :  { %s301_s23 = scalar_lea.vmem %s18_s13, 128  ;;  %p306_p4 = scmp.lt.s32.totalorder %s18_s13, %s18_s13 }
   0xb   :  { %p302_p3 = scmp.ne.s32.totalorder %s18_s13, %s301_s23  ;;  %p307_p5 = scmp.lt.s32.totalorder %s301_s23, %s301_s23 }
   0xd   :  { %p308_p6 = por %p307_p5, %p306_p4 }
   0xf   :  { %p309_p7 = pnand %p308_p6, %p302_p3 }
  0x11   :  { %312 = shalt.err (!%p309_p7)
}
  0x12   :  { %20 = dma.hbm_to_vmem [thread:$0]  %s441_s0, 128, %s18_s13, [#allocation3]  }
  0x13   :  { %s313_s28 = scalar_lea.hbm %s442_s1, 2048 }
  0x14   :  { %p314_p8 = scmp.ne.s32.totalorder %s442_s1, %s313_s28  ;;  %p317_p9 = scmp.lt.u32.totalorder %s313_s28, %s442_s1 }
  0x16   :  { %p319_p10 = pnand %p317_p9, %p314_p8 }
  0x18   :  { %322 = shalt.err (!%p319_p10)
}
  0x19   :  { %s323_s6 = scalar_lea.vmem %s389_s15, 2048  ;;  %p328_p12 = scmp.lt.s32.totalorder %s389_s15, %s389_s15 }
  0x1a   :  { %p324_p11 = scmp.ne.s32.totalorder %s389_s15, %s323_s6  ;;  %p329_p13 = scmp.lt.s32.totalorder %s323_s6, %s323_s6 }
  0x1c   :  { %p330_p0 = por %p329_p13, %p328_p12 }
  0x1e   :  { %p331_p1 = pnand %p330_p0, %p324_p11 }
  0x20   :  { %334 = shalt.err (!%p331_p1)
}
  0x21   :  { %s365_s0 = smov 512   ;;  %s366_s7 = smov 32  }
  0x22   :  { %32 = dma.hbm_to_vmem [thread:$0]  %s442_s1, 2048, %s389_s15, [#allocation6], %s365_s0, %s365_s0, %s366_s7  }
  0x23   :  { %357 = dma.done.wait [#allocation3], 128  }
  0x24   :  { %358 = vsyncadd [#allocation3], 4294967168 }
  0x25   :  { %359 = dma.done.wait [#allocation6], 2048  }
  0x26   :  { %360 = vsyncadd [#allocation6], 4294965248  ;;  %v367_v0 = vmov 0.0   ;;  %v48_v1 = vld [vmem:[#allocation5 + $0x8] sm:$0xff]  ;;  %v50_v3 = vld [vmem:[#allocation5 + $0x18] sm:$0xff]  ;;  %vm63_vm2 = vcmask 261120   ;;  %v211_v29 = vlaneseq }
  0x27   :  { %131 = vmatprep.mubr.f32.mxu0 %v367_v0  ;;  %202 = vmatprep.mubr.f32.mxu1 %v367_v0  ;;  %v52_v2 = vld [vmem:[#allocation5 + $0x28] sm:$0xff]  ;;  %v54_v5 = vld [vmem:[#allocation5 + $0x38] sm:$0xff]  ;;  %v47_v6 = vld [vmem:[#allocation5] sm:$0xff]  ;;  %s368_s11 = smov [#allocation7]  }
  0x28   :  { %v269_v4 = vpack.c.bf16 %v52_v2, %v48_v1  ;;  %v51_v7 = vld [vmem:[#allocation5 + $0x20] sm:$0xff]  ;;  %v277_v8 = vpack.c.bf16 %v54_v5, %v50_v3  ;;  %v49_v10 = vld [vmem:[#allocation5 + $0x10] sm:$0xff]  ;;  %v56_v12 = vld [vmem:[#allocation5 + $0x48] sm:$0xff]  ;;  %v212_v30 = vshrl.u32 %v211_v29, 7  ;;  %s253_s12 = sshll.u32 %s368_s11, 4  ;;  %s254_s12 = int_to_ptr.vmem [resolvable:$true] %s253_s12 }
  0x29   :  { %v271_v9 = vpack.c.bf16 %v51_v7, %v47_v6  ;;  %v53_v11 = vld [vmem:[#allocation5 + $0x30] sm:$0xff]  ;;  %v60_v14 = vld [vmem:[#allocation5 + $0x68] sm:$0xff]  ;;  %v58_v15 = vld [vmem:[#allocation5 + $0x58] sm:$0xff]  ;;  %p340_p3 = scmp.lt.s32.totalorder %s254_s12, %s254_s12 }
  0x2a   :  { %270 = vmatprep.subr.bf16.mxu0 %v269_v4  ;;  %v279_v13 = vpack.c.bf16 %v53_v11, %v49_v10  ;;  %v62_v16 = vld [vmem:[#allocation5 + $0x78] sm:$0xff]  ;;  %278 = vmatprep.subr.bf16.mxu1 %v277_v8  ;;  %v273_v17 = vpack.c.bf16 %v60_v14, %v56_v12  ;;  %v55_v19 = vld [vmem:[#allocation5 + $0x40] sm:$0xff]  ;;  %v57_v21 = vld [vmem:[#allocation5 + $0x50] sm:$0xff]  ;;  %v213_v31 = vsub.s32 0, %v212_v30  ;;  %v221_v32 = vsub.s32 2, %v212_v30 }
  0x2b   :  { %272 = vmatpush1.bf16.msra.mxu0 %v271_v9  ;;  %v281_v18 = vpack.c.bf16 %v62_v16, %v58_v15  ;;  %v59_v20 = vld [vmem:[#allocation5 + $0x60] sm:$0xff]  ;;  %v61_v23 = vld [vmem:[#allocation5 + $0x70] sm:$0xff]  ;;  %v41_v24 = vld [vmem:[#allocation2] sm:$0xff]  ;;  %v217_v34 = vsub.s32 1, %v212_v30  ;;  %v225_v35 = vsub.s32 3, %v212_v30 }
  0x2c   :  { %280 = vmatpush1.bf16.msra.mxu1 %v279_v13  ;;  %v275_v22 = vpack.c.bf16 %v59_v20, %v55_v19  ;;  %274 = vmatprep.subr.bf16.mxu0 %v273_v17  ;;  %v283_v25 = vpack.c.bf16 %v61_v23, %v57_v21  ;;  %vm42_vm0 = vcmp.gt.s32.totalorder %v41_v24, 4294967295  ;;  %v209_v33 = vld [vmem:[%s443_s2] sm:$0xf]  ;;  %s335_s2 = scalar_lea.vmem %s254_s12, 512 }
  0x2d   :  { %282 = vmatprep.subr.bf16.mxu1 %v281_v18  ;;  %v43_v26 = vsel %vm42_vm0, %v41_v24, 4294967295  ;;  %v214_v36 = vrot.slane %v209_v33, %v213_v31  ;;  %v222_v37 = vrot.slane %v209_v33, %v221_v32  ;;  %v218_v38 = vrot.slane %v209_v33, %v217_v34  ;;  %p336_p2 = scmp.ne.s32.totalorder %s254_s12, %s335_s2  ;;  %p341_p4 = scmp.lt.s32.totalorder %s335_s2, %s335_s2 }
  0x2e   :  { %vm44_vm1 = vcmp.lt.s32.totalorder %v43_v26, 16  ;;  %v226_v39 = vrot.slane %v209_v33, %v225_v35 }
  0x2f   :  { %276 = vmatpush1.bf16.msra.mxu0 %v275_v22  ;;  %v45_v27 = vsel %vm44_vm1, %v43_v26, 16  ;;  %p342_p5 = por %p341_p4, %p340_p3 }
  0x30   :  { %284 = vmatpush1.bf16.msra.mxu1 %v283_v25  ;;  %v46_v28 = vcvt.s32.f32 %v45_v27 }
  0x31   :  { %p343_p6 = pnand %p342_p5, %p336_p2 }
  0x32   :  { %263 = vmatmul.mubr.msk.f32.vlgmr.msra.gmra.mrb[0].mxu0 %vm63_vm2, %v46_v28 }
  0x33   :  { %264 = vmatmul.mubr.msk.f32.vlgmr.msra.gmra.mrb[0].mxu1 %vm63_vm2, %v46_v28 }
 0x105   :  { %v133_v40 = vpop.f32.mrb[0].mxu0 }
 0x106   :  { %v204_v41 = vpop.f32.mrb[0].mxu1  ;;  %vm231_vm3 = vcmp.eq.f32.partialorder %v133_v40, %v214_v36  ;;  %v135_v42 = vpop.f32.mrb[1].mxu0 }
 0x107   :  { %vm233_vm4 = vcmp.eq.f32.partialorder %v204_v41, %v222_v37  ;;  %v206_v43 = vpop.f32.mrb[1].mxu1  ;;  %v265_v44 = vsel %vm231_vm3, 1.0, %v367_v0  ;;  %vm232_vm5 = vcmp.eq.f32.partialorder %v135_v42, %v218_v38 }
 0x108   :  { %v267_v45 = vsel %vm233_vm4, 1.0, %v367_v0  ;;  %vm234_vm6 = vcmp.eq.f32.partialorder %v206_v43, %v226_v39  ;;  %243 = vst [vmem:[#allocation7] sm:$0xff] %v265_v44  ;;  %v266_v46 = vsel %vm232_vm5, 1.0, %v367_v0 }
 0x109   :  { %245 = vst [vmem:[#allocation7 + $0x10] sm:$0xff] %v267_v45  ;;  %v268_v47 = vsel %vm234_vm6, 1.0, %v367_v0  ;;  %244 = vst [vmem:[#allocation7 + $0x8] sm:$0xff] %v266_v46 }
 0x10a   :  { %246 = vst [vmem:[#allocation7 + $0x18] sm:$0xff] %v268_v47 }
 0x10b   :  { %346 = shalt.err (!%p343_p6)
}
 0x10c   :  { %s347_s15 = scalar_lea.hbm %s444_s3, 512 }
 0x10d   :  { %p348_p7 = scmp.ne.s32.totalorder %s444_s3, %s347_s15  ;;  %p351_p8 = scmp.lt.u32.totalorder %s347_s15, %s444_s3 }
 0x10f   :  { %p353_p9 = pnand %p351_p8, %p348_p7 }
 0x111   :  { %356 = shalt.err (!%p353_p9)
}
 0x112   :  { %256 = dma.vmem_to_hbm [thread:$0]  %s254_s12, 512, %s444_s3, [#allocation4]  }
 0x113   :  { %361 = dma.done.wait [#allocation4], 512  }
 0x114   :  { %362 = vsyncadd [#allocation4], 4294966784 }
 0x115   :  { %260 = vsyncpa [#allocation3], 1 }
 0x116   :  { %261 = vsyncpa [#allocation6], 1 }
 0x117   :  { %262 = vsyncpa [#allocation4], 1 }

</bundles_post_ra>
